<compile_context>
chip_gen: v7x
topology: tpu7x:2x2x1
jax: 0.10.0
libtpu: 0.0.40
codegen_flags: <defaults>
</compile_context>

<pallas_src>
import functools

import jax
import jax.numpy as jnp
import numpy as np
from jax import lax
from jax.experimental import pallas as pl
from jax.experimental.pallas import tpu as pltpu

LANE = 128
VMEM_LIMIT = 48 * 1024 * 1024   # stay under the v7x 64 MiB physical ceiling


# ------------------------------------------------------------------ small helpers
def _rup(c):
    return ((c + LANE - 1) // LANE) * LANE


def _tile_and_pad(dim, target, align):
    """Return (tile, padded_dim): tile <= target, multiple of align, padded_dim % tile == 0."""
    if dim <= target:
        pd = dim + (-dim) % align
        return pd, pd
    t = max(align, target - target % align)
    tt = t
    while tt >= align:
        if dim % tt == 0:
            return tt, dim
        tt -= align
    return t, dim + (-dim) % t


def _pick_ctile(n, pref=512):
    """Channel-axis tile (n is already a multiple of 128)."""
    if n <= pref:
        return n
    for t in (512, 256, 128):
        if t <= pref and n % t == 0:
            return t
    return LANE


def _pick_tho(ho, wo, max_rows=1024):
    """Rows-of-output tile for the 3x3 conv: divisor of ho, lane/sublane friendly."""
    best = None
    for tho in range(1, ho + 1):
        if ho % tho:
            continue
        rows = tho * wo
        if rows % 8 != 0 and tho != ho:
            continue
        if rows <= max_rows:
            best = tho
    return best if best is not None else ho


def _pad1(v, n):
    v = jnp.asarray(v, jnp.float32).reshape(1, -1)
    return jnp.pad(v, ((0, 0), (0, n - v.shape[1])))


def _pad2(m, r, c):
    m = jnp.asarray(m, jnp.float32)
    return jnp.pad(m, ((0, r - m.shape[0]), (0, c - m.shape[1])))


def _pad_lanes(x, c):
    pad = c - x.shape[-1]
    if pad == 0:
        return x
    widths = [(0, 0)] * (x.ndim - 1) + [(0, pad)]
    return jnp.pad(x, widths)


# ------------------------------------------------ tiled matmul + BN affine + activation
def _matmul_bn_act_kernel(a_ref, b_ref, scale_ref, shift_ref, o_ref, acc_ref, *, act):
    @pl.when(pl.program_id(2) == 0)
    def _init():
        acc_ref[...] = jnp.zeros_like(acc_ref)

    acc_ref[...] += jnp.dot(a_ref[...], b_ref[...], preferred_element_type=jnp.float32)

    @pl.when(pl.program_id(2) == pl.num_programs(2) - 1)
    def _finalize():
        y = acc_ref[...] * scale_ref[...] + shift_ref[...]
        if act == "relu":
            y = jnp.maximum(y, 0.0)
        o_ref[...] = y.astype(o_ref.dtype)


def matmul_bn_act(a, b, scale, shift, act="none", out_dtype=jnp.bfloat16):
    """out = act((a @ b) * scale + shift); bf16 operands, f32 MXU accumulation."""
    M, K = a.shape
    K2, N = b.shape
    assert K == K2 and K % LANE == 0 and N % LANE == 0
    tm, Mp = _tile_and_pad(M, 1024, 8)        # thin-K regime: big M tiles
    if Mp != M:
        a = jnp.pad(a, ((0, Mp - M), (0, 0)))
    tn = _pick_ctile(N, 512)
    tk = _pick_ctile(K, 512)
    grid = (Mp // tm, N // tn, K // tk)

    out = pl.pallas_call(
        functools.partial(_matmul_bn_act_kernel, act=act),
        out_shape=jax.ShapeDtypeStruct((Mp, N), out_dtype),
        grid=grid,
        in_specs=[
            pl.BlockSpec((tm, tk), lambda i, j, k: (i, k)),
            pl.BlockSpec((tk, tn), lambda i, j, k: (k, j)),
            pl.BlockSpec((1, tn), lambda i, j, k: (0, j)),
            pl.BlockSpec((1, tn), lambda i, j, k: (0, j)),
        ],
        out_specs=pl.BlockSpec((tm, tn), lambda i, j, k: (i, j)),
        scratch_shapes=[pltpu.VMEM((tm, tn), jnp.float32)],
        compiler_params=pltpu.CompilerParams(
            dimension_semantics=("parallel", "parallel", "arbitrary"),
            vmem_limit_bytes=VMEM_LIMIT,
        ),
    )(a.astype(jnp.bfloat16), b.astype(jnp.bfloat16), scale, shift)
    return out[:M] if Mp != M else out


# -------------------------------------------------- 3x3 conv (phase-split, K-packed taps)
def _phase_decompose(h1p, stride, ho, wo):
    """Space-to-batch phase split of the spatially padded activation (stride > 1).

    Returns (N*stride*stride, hpp, wpp, C); tap (kh, kw) of the 3x3/stride conv reads a
    contiguous window of phase (kh%stride)*stride + (kw%stride)."""
    # TODO(synk): fuse the halo read by DMA-ing h1 row bands directly (memory_space=pl.ANY)
    #             instead of materializing the phase planes in HBM for stride > 1.
    n, _, _, c = h1p.shape
    extra = 2 // stride
    hpp, wpp = ho + extra, wo + extra
    phases = []
    for ph in range(stride):
        for pw in range(stride):
            sub = h1p[:, ph::stride, pw::stride, :][:, :hpp, :wpp, :]
            sub = jnp.pad(
                sub, ((0, 0), (0, hpp - sub.shape[1]), (0, wpp - sub.shape[2]), (0, 0)))
            phases.append(sub)
    ph_arr = jnp.stack(phases, axis=1)            # (N, s*s, hpp, wpp, C)
    return ph_arr.reshape(n * stride * stride, hpp, wpp, c)


def _conv3x3_bn_relu_kernel(x_ref, w_ref, scale_ref, shift_ref, o_ref, pack_ref,
                            *, stride, tho, wo):
    j = pl.program_id(1)
    cp_in = x_ref.shape[-1]
    rows = tho * wo
    # Pack the 9 taps along the contraction axis (one VMEM write per tap), then a single
    # MXU dot with K = 9*cp_in -> no per-tap f32 accumulator read-modify-writes.
    for kh in range(3):
        for kw in range(3):
            phase = (kh % stride) * stride + (kw % stride)
            ih, iw = kh // stride, kw // stride
            patch = x_ref[phase, pl.ds(j * tho + ih, tho), pl.ds(iw, wo), :]
            tap = kh * 3 + kw
            pack_ref[:, tap * cp_in:(tap + 1) * cp_in] = patch.reshape(rows, cp_in)
    y = jnp.dot(pack_ref[...], w_ref[...], preferred_element_type=jnp.float32)
    y = y * scale_ref[...] + shift_ref[...]
    o_ref[0] = jnp.maximum(y, 0.0).astype(o_ref.dtype)


def conv3x3_bn_relu(phases, w9, scale, shift, *, stride, ho, wo, n,
                    out_dtype=jnp.bfloat16):
    s2 = stride * stride
    _, hpp, wpp, cp_in = phases.shape
    cp_out = w9.shape[-1]
    tho = _pick_tho(ho, wo)
    rows = tho * wo
    grid = (n, ho // tho)
    return pl.pallas_call(
        functools.partial(_conv3x3_bn_relu_kernel, stride=stride, tho=tho, wo=wo),
        out_shape=jax.ShapeDtypeStruct((n, ho * wo, cp_out), out_dtype),
        grid=grid,
        in_specs=[
            # full phase-split image stays resident across the row-block axis j
            pl.BlockSpec((s2, hpp, wpp, cp_in), lambda i, j: (i, 0, 0, 0)),
            pl.BlockSpec((9 * cp_in, cp_out), lambda i, j: (0, 0)),
            pl.BlockSpec((1, cp_out), lambda i, j: (0, 0)),
            pl.BlockSpec((1, cp_out), lambda i, j: (0, 0)),
        ],
        out_specs=pl.BlockSpec((1, rows, cp_out), lambda i, j: (i, j, 0)),
        scratch_shapes=[pltpu.VMEM((rows, 9 * cp_in), jnp.bfloat16)],
        compiler_params=pltpu.CompilerParams(
            dimension_semantics=("parallel", "parallel"),
            vmem_limit_bytes=VMEM_LIMIT,
        ),
    )(phases.astype(jnp.bfloat16), w9.astype(jnp.bfloat16), scale, shift)


# ------------------------------------- conv3 (1x1) + BN with fused SE weighted pooling
def _conv1x1_bn_pool_kernel(a_ref, b_ref, scale_ref, shift_ref, weff_ref,
                            res_ref, pool_ref, acc_ref):
    j = pl.program_id(1)
    k = pl.program_id(2)

    @pl.when(k == 0)
    def _init_acc():
        acc_ref[...] = jnp.zeros_like(acc_ref)

    @pl.when((j == 0) & (k == 0))
    def _init_pool():
        pool_ref[...] = jnp.zeros_like(pool_ref)

    acc_ref[...] += jnp.dot(a_ref[0], b_ref[...], preferred_element_type=jnp.float32)

    @pl.when(k == pl.num_programs(2) - 1)
    def _finalize():
        y = acc_ref[...] * scale_ref[...] + shift_ref[...]
        yq = y.astype(res_ref.dtype)
        res_ref[0] = yq
        # SE pools (1/2/4) + depthwise fc_spatial{1,2,4} folded into per-pixel weights;
        # pooled vector accumulated here so res never has to be re-read from HBM.
        pool_ref[0] += jnp.sum(yq.astype(jnp.float32) * weff_ref[...],
                               axis=0, keepdims=True)


def conv1x1_bn_pool(a3d, b, scale, shift, weff, *, tp, out_dtype=jnp.bfloat16):
    n, Pp, K = a3d.shape
    K2, N = b.shape
    assert K == K2 and Pp % tp == 0
    tk = _pick_ctile(K, 512)
    grid = (n, Pp // tp, K // tk)
    res, pooled = pl.pallas_call(
        _conv1x1_bn_pool_kernel,
        out_shape=(jax.ShapeDtypeStruct((n, Pp, N), out_dtype),
                   jax.ShapeDtypeStruct((n, 1, N), jnp.float32)),
        grid=grid,
        in_specs=[
            pl.BlockSpec((1, tp, tk), lambda i, j, k: (i, j, k)),
            pl.BlockSpec((tk, N), lambda i, j, k: (k, 0)),
            pl.BlockSpec((1, N), lambda i, j, k: (0, 0)),
            pl.BlockSpec((1, N), lambda i, j, k: (0, 0)),
            pl.BlockSpec((tp, N), lambda i, j, k: (j, 0)),
        ],
        out_specs=(pl.BlockSpec((1, tp, N), lambda i, j, k: (i, j, 0)),
                   pl.BlockSpec((1, 1, N), lambda i, j, k: (i, 0, 0))),
        scratch_shapes=[pltpu.VMEM((tp, N), jnp.float32)],
        compiler_params=pltpu.CompilerParams(
            dimension_semantics=("parallel", "arbitrary", "arbitrary"),
            vmem_limit_bytes=VMEM_LIMIT,
        ),
    )(a3d.astype(jnp.bfloat16), b.astype(jnp.bfloat16), scale, shift, weff)
    return res, pooled


# --------------------------------------------------------- tiny SE FC chain (all images)
def _se_fc_kernel(pool_ref, b_ref, s_ref, t_ref, rw_ref, rb_ref, ew_ref, eb_ref, o_ref):
    pre = jnp.maximum((pool_ref[...] + b_ref[...]) * s_ref[...] + t_ref[...], 0.0)
    z = jnp.maximum(
        jnp.dot(pre, rw_ref[...], preferred_element_type=jnp.float32) + rb_ref[...], 0.0)
    g = jax.nn.sigmoid(
        jnp.dot(z, ew_ref[...], preferred_element_type=jnp.float32) + eb_ref[...])
    o_ref[...] = g


def se_fc(pooled, bsum, scale, shift, rw, rb, ew, eb):
    n, cp = pooled.shape
    np8 = n + (-n) % 8
    if np8 != n:
        pooled = jnp.pad(pooled, ((0, np8 - n), (0, 0)))
    cr = rw.shape[-1]
    gate = pl.pallas_call(
        _se_fc_kernel,
        out_shape=jax.ShapeDtypeStruct((np8, cp), jnp.float32),
        grid=(1,),
        in_specs=[
            pl.BlockSpec((np8, cp), lambda i: (0, 0)),
            pl.BlockSpec((1, cp), lambda i: (0, 0)),
            pl.BlockSpec((1, cp), lambda i: (0, 0)),
            pl.BlockSpec((1, cp), lambda i: (0, 0)),
            pl.BlockSpec((cp, cr), lambda i: (0, 0)),
            pl.BlockSpec((1, cr), lambda i: (0, 0)),
            pl.BlockSpec((cr, cp), lambda i: (0, 0)),
            pl.BlockSpec((1, cp), lambda i: (0, 0)),
        ],
        out_specs=pl.BlockSpec((np8, cp), lambda i: (0, 0)),
    )(pooled, bsum, scale, shift, rw.astype(jnp.float32), rb,
      ew.astype(jnp.float32), eb)
    return gate[:n]


# ---------------------------------- gate*res + shortcut + relu (projection conv fused)
def _gate_residual_proj_kernel(res_ref, gate_ref, xs_ref, ws_ref, s_ref, t_ref, o_ref):
    short = (jnp.dot(xs_ref[0], ws_ref[...], preferred_element_type=jnp.float32)
             * s_ref[...] + t_ref[...])
    y = res_ref[0].astype(jnp.float32) * gate_ref[0] + short
    o_ref[0] = jnp.maximum(y, 0.0).astype(o_ref.dtype)


def gate_residual_proj(res3d, gate, xs, ws, s, t, *, tp, out_dtype=jnp.bfloat16):
    n, Pp, cp_out = res3d.shape
    cp_in = xs.shape[-1]
    grid = (n, Pp // tp)
    return pl.pallas_call(
        _gate_residual_proj_kernel,
        out_shape=jax.ShapeDtypeStruct((n, Pp, cp_out), out_dtype),
        grid=grid,
        in_specs=[
            pl.BlockSpec((1, tp, cp_out), lambda i, j: (i, j, 0)),
            pl.BlockSpec((1, 1, cp_out), lambda i, j: (i, 0, 0)),
            pl.BlockSpec((1, tp, cp_in), lambda i, j: (i, j, 0)),
            pl.BlockSpec((cp_in, cp_out), lambda i, j: (0, 0)),
            pl.BlockSpec((1, cp_out), lambda i, j: (0, 0)),
            pl.BlockSpec((1, cp_out), lambda i, j: (0, 0)),
        ],
        out_specs=pl.BlockSpec((1, tp, cp_out), lambda i, j: (i, j, 0)),
        compiler_params=pltpu.CompilerParams(
            dimension_semantics=("parallel", "parallel"),
            vmem_limit_bytes=VMEM_LIMIT,
        ),
    )(res3d, gate, xs.astype(jnp.bfloat16), ws.astype(jnp.bfloat16), s, t)


def _gate_residual_id_kernel(res_ref, gate_ref, short_ref, o_ref):
    y = res_ref[0].astype(jnp.float32) * gate_ref[0] + short_ref[0].astype(jnp.float32)
    o_ref[0] = jnp.maximum(y, 0.0).astype(o_ref.dtype)


def gate_residual_id(res3d, gate, short3d, *, tp, out_dtype=jnp.bfloat16):
    n, Pp, cp_out = res3d.shape
    grid = (n, Pp // tp)
    return pl.pallas_call(
        _gate_residual_id_kernel,
        out_shape=jax.ShapeDtypeStruct((n, Pp, cp_out), out_dtype),
        grid=grid,
        in_specs=[
            pl.BlockSpec((1, tp, cp_out), lambda i, j: (i, j, 0)),
            pl.BlockSpec((1, 1, cp_out), lambda i, j: (i, 0, 0)),
            pl.BlockSpec((1, tp, cp_out), lambda i, j: (i, j, 0)),
        ],
        out_specs=pl.BlockSpec((1, tp, cp_out), lambda i, j: (i, j, 0)),
        compiler_params=pltpu.CompilerParams(
            dimension_semantics=("parallel", "parallel"),
            vmem_limit_bytes=VMEM_LIMIT,
        ),
    )(res3d, gate, short3d)


# ------------------------------------------------------------------------- parameters
def init_params(key, c_in, c_base, stride):
    c_mid, c_out = c_base, 4 * c_base
    keys = iter(jax.random.split(key, 64))

    def nrm(shape, s=0.1):
        return jax.random.normal(next(keys), shape, jnp.float32) * s

    def bn_affine(c):
        gamma = 1.0 + nrm((c,))
        beta = nrm((c,))
        mean = nrm((c,))
        var = 1.0 + jax.random.uniform(next(keys), (c,), jnp.float32)
        scale = gamma * lax.rsqrt(var + 1e-5)
        return scale, beta - mean * scale

    p = {}
    p["conv1_w"] = nrm((c_mid, c_in, 1, 1))          # torch OIHW
    p["bn1"] = bn_affine(c_mid)
    p["conv2_w"] = nrm((c_mid, c_mid, 3, 3))
    p["bn2"] = bn_affine(c_mid)
    p["conv3_w"] = nrm((c_out, c_mid, 1, 1))
    p["bn3"] = bn_affine(c_out)
    if c_in != c_out or stride != 1:
        p["short_w"] = nrm((c_out, c_in, 1, 1))
        p["bns"] = bn_affine(c_out)
    else:
        p["short_w"] = None
    p["sp1_w"] = nrm((c_out, 1, 1, 1)); p["sp1_b"] = nrm((c_out,))
    p["sp2_w"] = nrm((c_out, 1, 2, 2)); p["sp2_b"] = nrm((c_out,))
    p["sp4_w"] = nrm((c_out, 1, 4, 4)); p["sp4_b"] = nrm((c_out,))
    p["fcbn"] = bn_affine(c_out)
    c_red = c_out // 16
    p["red_w"] = nrm((c_red, c_out)); p["red_b"] = nrm((c_red,))
    p["ext_w"] = nrm((c_out, c_red)); p["ext_b"] = nrm((c_out,))
    return p


def build_weff(p, ho, wo):
    """Per-pixel effective weights folding pool1/2/4 + depthwise fc_spatial{1,2,4}."""
    # TODO(synk): matches AdaptiveAvgPool2d only when ho, wo are divisible by 4.
    assert ho % 4 == 0 and wo % 4 == 0, "folded SE path needs spatial dims divisible by 4"
    c = p["sp1_w"].shape[0]
    m1 = jnp.broadcast_to(p["sp1_w"][:, 0, 0, 0].reshape(1, 1, c), (ho, wo, c)) / (ho * wo)
    w2 = p["sp2_w"][:, 0]                                     # (C, 2, 2)
    m2 = jnp.repeat(jnp.repeat(w2, ho // 2, axis=1), wo // 2, axis=2)
    m2 = jnp.transpose(m2, (1, 2, 0)) / ((ho // 2) * (wo // 2))
    w4 = p["sp4_w"][:, 0]                                     # (C, 4, 4)
    m4 = jnp.repeat(jnp.repeat(w4, ho // 4, axis=1), wo // 4, axis=2)
    m4 = jnp.transpose(m4, (1, 2, 0)) / ((ho // 4) * (wo // 4))
    return (m1 + m2 + m4).reshape(ho * wo, c)


# ---------------------------------------------------------------------------- forward
def bottleneck_forward(x_nchw, p, stride):
    n, c_in, h, w = x_nchw.shape
    c_mid = p["conv1_w"].shape[0]
    c_out = p["conv3_w"].shape[0]
    c_red = p["red_w"].shape[0]
    cp_in, cp_mid, cp_out, cp_red = (_rup(c) for c in (c_in, c_mid, c_out, c_red))

    # TODO(synk): in a multi-block network keep activations NHWC and channel-padded
    #             end-to-end; the boundary transposes only match the PyTorch interface.
    x = jnp.transpose(x_nchw, (0, 2, 3, 1))
    x = _pad_lanes(x, cp_in).astype(jnp.bfloat16)             # (N,H,W,Cp_in), lane-dense

    # conv1 (1x1) + bn1 + relu
    w1 = _pad2(p["conv1_w"][:, :, 0, 0].T, cp_in, cp_mid)
    h1 = matmul_bn_act(x.reshape(n * h * w, cp_in), w1,
                       _pad1(p["bn1"][0], cp_mid), _pad1(p["bn1"][1], cp_mid), act="relu")
    h1 = h1.reshape(n, h, w, cp_mid)

    # conv2 (3x3, stride, pad=1) + bn2 + relu  (K-packed taps, row-block tiled)
    ho = (h - 1) // stride + 1
    wo = (w - 1) // stride + 1
    h1p = jnp.pad(h1, ((0, 0), (1, 1), (1, 1), (0, 0)))
    if stride == 1:
        phases = h1p                                           # (N, H+2, W+2, Cp) ; s2 = 1
    else:
        phases = _phase_decompose(h1p, stride, ho, wo)         # (N*s2, hpp, wpp, Cp)
    w9 = jnp.concatenate([_pad2(p["conv2_w"][:, :, kh, kw].T, cp_mid, cp_mid)
                          for kh in range(3) for kw in range(3)], axis=0)   # (9*Cp, Cp)
    h2 = conv3x3_bn_relu(phases, w9, _pad1(p["bn2"][0], cp_mid), _pad1(p["bn2"][1], cp_mid),
                         stride=stride, ho=ho, wo=wo, n=n)     # (N, ho*wo, Cp_mid) bf16

    # conv3 (1x1) + bn3 with fused SE weighted pool
    P = ho * wo
    tp, Pp = _tile_and_pad(P, 512, 8)
    weff = _pad_lanes(build_weff(p, ho, wo), cp_out)           # (P, Cp_out) f32
    if Pp != P:
        h2 = jnp.pad(h2, ((0, 0), (0, Pp - P), (0, 0)))
        weff = jnp.pad(weff, ((0, Pp - P), (0, 0)))            # zero rows -> pool-safe
    w3 = _pad2(p["conv3_w"][:, :, 0, 0].T, cp_mid, cp_out)
    res3d, pooled = conv1x1_bn_pool(
        h2, w3, _pad1(p["bn3"][0], cp_out), _pad1(p["bn3"][1], cp_out), weff, tp=tp)

    # SE FC chain (batched over all images) -> per-channel gate
    bsum = _pad1(p["sp1_b"] + p["sp2_b"] + p["sp4_b"], cp_out)
    gate = se_fc(pooled.reshape(n, cp_out), bsum,
                 _pad1(p["fcbn"][0], cp_out), _pad1(p["fcbn"][1], cp_out),
                 _pad2(p["red_w"].T, cp_out, cp_red), _pad1(p["red_b"], cp_red),
                 _pad2(p["ext_w"].T, cp_red, cp_out), _pad1(p["ext_b"], cp_out))
    gate = gate.reshape(n, 1, cp_out)

    # gate * res + shortcut + relu (projection conv+BN fused in-kernel when present)
    if p["short_w"] is not None:
        xs = x[:, ::stride, ::stride, :].reshape(n, P, cp_in)
        if Pp != P:
            xs = jnp.pad(xs, ((0, 0), (0, Pp - P), (0, 0)))
        ws = _pad2(p["short_w"][:, :, 0, 0].T, cp_in, cp_out)
        out = gate_residual_proj(res3d, gate, xs, ws,
                                 _pad1(p["bns"][0], cp_out), _pad1(p["bns"][1], cp_out),
                                 tp=tp)
    else:
        short = x.reshape(n, P, cp_out)
        if Pp != P:
            short = jnp.pad(short, ((0, 0), (0, Pp - P), (0, 0)))
        out = gate_residual_id(res3d, gate, short, tp=tp)

    out = out[:, :P, :].reshape(n, ho, wo, cp_out)[:, :, :, :c_out]
    return jnp.transpose(out.astype(jnp.float32), (0, 3, 1, 2))


# --------------------------------------------------------------------------- reference
def _q(x):
    """bf16 round-trip (mirrors the kernel's bf16 operands / bf16 intermediates)."""
    return x.astype(jnp.bfloat16).astype(jnp.float32)


def reference_forward(x_nchw, p, stride):
    def conv(x, w, s, pad):
        return lax.conv_general_dilated(
            x, jnp.transpose(_q(w), (2, 3, 1, 0)), window_strides=(s, s),
            padding=[(pad, pad), (pad, pad)],
            dimension_numbers=("NHWC", "HWIO", "NHWC"))

    def bn(x, ss):
        return x * ss[0] + ss[1]

    x = _q(jnp.transpose(x_nchw, (0, 2, 3, 1)))
    h = _q(jax.nn.relu(bn(conv(x, p["conv1_w"], 1, 0), p["bn1"])))
    h = _q(jax.nn.relu(bn(conv(h, p["conv2_w"], stride, 1), p["bn2"])))
    res = _q(bn(conv(h, p["conv3_w"], 1, 0), p["bn3"]))
    if p["short_w"] is not None:
        # projection shortcut is fused in the kernel and kept in f32 (bf16 operands)
        sh = bn(conv(x, p["short_w"], stride, 0), p["bns"])
    else:
        sh = x
    n, ho, wo, c = res.shape

    def adpool(r, s):
        return r.reshape(n, s, ho // s, s, wo // s, c).mean(axis=(2, 4))

    se = (jnp.einsum("nijc,cij->nc", adpool(res, 1), p["sp1_w"][:, 0]) + p["sp1_b"]
          + jnp.einsum("nijc,cij->nc", adpool(res, 2), p["sp2_w"][:, 0]) + p["sp2_b"]
          + jnp.einsum("nijc,cij->nc", adpool(res, 4), p["sp4_w"][:, 0]) + p["sp4_b"])
    se = jax.nn.relu(se * p["fcbn"][0] + p["fcbn"][1])
    se = jax.nn.relu(se @ p["red_w"].T + p["red_b"])
    se = jax.nn.sigmoid(se @ p["ext_w"].T + p["ext_b"])
    out = jax.nn.relu(res * se[:, None, None, :] + sh)
    return _q(jnp.transpose(out, (0, 3, 1, 2)))


# --------------------------------------------------------------------------------- main
if __name__ == "__main__":
    key = jax.random.PRNGKey(0)
    kx, kp = jax.random.split(key)
    N, C_IN, H, W = 2, 4, 16, 16
    C_BASE, STRIDE = 8, 2          # conv3_out = 32, reduction channels = 2
    x = jax.random.normal(kx, (N, C_IN, H, W), jnp.float32)
    params = init_params(kp, C_IN, C_BASE, STRIDE)

    out = jax.block_until_ready(bottleneck_forward(x, params, STRIDE))
    ref = jax.block_until_ready(reference_forward(x, params, STRIDE))
    np.testing.assert_allclose(np.asarray(out), np.asarray(ref), rtol=1e-2, atol=1e-2)
    print("KERNEL_OK")
</pallas_src>

<mosaic_0001>
module attributes {stable_mosaic.version = 11 : i64} {
  func.func @_matmul_bn_act_kernel(%arg0: i32, %arg1: i32, %arg2: i32, %arg3: memref<512x128xbf16, #tpu.memory_space<vmem>>, %arg4: memref<128x128xbf16, #tpu.memory_space<vmem>>, %arg5: memref<1x128xf32, #tpu.memory_space<vmem>>, %arg6: memref<1x128xf32, #tpu.memory_space<vmem>>, %arg7: memref<512x128xbf16, #tpu.memory_space<vmem>>, %arg8: memref<512x128xf32, #tpu.memory_space<vmem>>) attributes {dimension_semantics = [#tpu.dimension_semantics<parallel>, #tpu.dimension_semantics<parallel>, #tpu.dimension_semantics<arbitrary>], iteration_bounds = array<i64: 1, 1, 1>, scalar_prefetch = 0 : i64, scratch_operands = 1 : i64, tpu.core_type = #tpu.core_type<tc>, window_params = [{transform_indices = @transform_0, window_bounds = array<i64: 512, 128>}, {transform_indices = @transform_1, window_bounds = array<i64: 128, 128>}, {transform_indices = @transform_2, window_bounds = array<i64: 1, 128>}, {transform_indices = @transform_3, window_bounds = array<i64: 1, 128>}, {transform_indices = @transform_4, window_bounds = array<i64: 512, 128>}]} {
    %c0_i32 = arith.constant 0 : i32
    %0 = arith.cmpi eq, %arg2, %c0_i32 : i32
    %1 = arith.extui %0 : i1 to i32
    %c0_i32_0 = arith.constant 0 : i32
    %2 = arith.cmpi ne, %1, %c0_i32_0 : i32
    scf.if %2 {
      %cst_10 = arith.constant 0.000000e+00 : f32
      %12 = vector.broadcast %cst_10 : f32 to vector<512x128xf32>
      %c0_11 = arith.constant 0 : index
      %c0_12 = arith.constant 0 : index
      %13 = vector.load %arg8[%c0_11, %c0_12] : memref<512x128xf32, #tpu.memory_space<vmem>>, vector<512x128xf32>
      tpu.vector_store %arg8[%c0_11, %c0_12], %12 {strides = array<i32>} : memref<512x128xf32, #tpu.memory_space<vmem>>, vector<512x128xf32>,
    } else {
    }
    %c0 = arith.constant 0 : index
    %c0_1 = arith.constant 0 : index
    %3 = vector.load %arg8[%c0, %c0_1] : memref<512x128xf32, #tpu.memory_space<vmem>>, vector<512x128xf32>
    %c0_2 = arith.constant 0 : index
    %c0_3 = arith.constant 0 : index
    %4 = vector.load %arg3[%c0_2, %c0_3] : memref<512x128xbf16, #tpu.memory_space<vmem>>, vector<512x128xbf16>
    %c0_4 = arith.constant 0 : index
    %c0_5 = arith.constant 0 : index
    %5 = vector.load %arg4[%c0_4, %c0_5] : memref<128x128xbf16, #tpu.memory_space<vmem>>, vector<128x128xbf16>
    %cst = arith.constant dense<0.000000e+00> : vector<512x128xf32>
    %6 = tpu.matmul %4, %5, %cst {dimension_numbers = #tpu.dot_dimension_numbers<[1], [0], [0], [1], [0, 0, 1, 1], [], []>} : vector<512x128xbf16>, vector<128x128xbf16>, vector<512x128xf32> -> vector<512x128xf32>
    %7 = arith.addf %3, %6 : vector<512x128xf32>
    %c0_6 = arith.constant 0 : index
    %c0_7 = arith.constant 0 : index
    %8 = vector.load %arg8[%c0_6, %c0_7] : memref<512x128xf32, #tpu.memory_space<vmem>>, vector<512x128xf32>
    tpu.vector_store %arg8[%c0_6, %c0_7], %7 {strides = array<i32>} : memref<512x128xf32, #tpu.memory_space<vmem>>, vector<512x128xf32>,
    %c0_i32_8 = arith.constant 0 : i32
    %9 = arith.cmpi eq, %arg2, %c0_i32_8 : i32
    %10 = arith.extui %9 : i1 to i32
    %c0_i32_9 = arith.constant 0 : i32
    %11 = arith.cmpi ne, %10, %c0_i32_9 : i32
    scf.if %11 {
      %c0_10 = arith.constant 0 : index
      %c0_11 = arith.constant 0 : index
      %12 = vector.load %arg8[%c0_10, %c0_11] : memref<512x128xf32, #tpu.memory_space<vmem>>, vector<512x128xf32>
      %c0_12 = arith.constant 0 : index
      %c0_13 = arith.constant 0 : index
      %13 = vector.load %arg5[%c0_12, %c0_13] : memref<1x128xf32, #tpu.memory_space<vmem>>, vector<1x128xf32>
      %14 = vector.broadcast %13 : vector<1x128xf32> to vector<512x128xf32>
      %15 = arith.mulf %12, %14 : vector<512x128xf32>
      %c0_14 = arith.constant 0 : index
      %c0_15 = arith.constant 0 : index
      %16 = vector.load %arg6[%c0_14, %c0_15] : memref<1x128xf32, #tpu.memory_space<vmem>>, vector<1x128xf32>
      %17 = vector.broadcast %16 : vector<1x128xf32> to vector<512x128xf32>
      %18 = arith.addf %15, %17 : vector<512x128xf32>
      %cst_16 = arith.constant 0.000000e+00 : f32
      %19 = vector.broadcast %cst_16 : f32 to vector<512x128xf32>
      %20 = arith.maximumf %18, %19 : vector<512x128xf32>
      %21 = arith.truncf %20 : vector<512x128xf32> to vector<512x128xbf16>
      %c0_17 = arith.constant 0 : index
      %c0_18 = arith.constant 0 : index
      %22 = vector.load %arg7[%c0_17, %c0_18] : memref<512x128xbf16, #tpu.memory_space<vmem>>, vector<512x128xbf16>
      tpu.vector_store %arg7[%c0_17, %c0_18], %21 {strides = array<i32>} : memref<512x128xbf16, #tpu.memory_space<vmem>>, vector<512x128xbf16>,
    } else {
    }
    return
  }
  func.func @transform_0(%arg0: i32, %arg1: i32, %arg2: i32) -> (i32, i32) {
    %c0_i32 = arith.constant 0 : i32
    return %arg0, %arg2 : i32, i32
  }
  func.func @transform_1(%arg0: i32, %arg1: i32, %arg2: i32) -> (i32, i32) {
    %c0_i32 = arith.constant 0 : i32
    return %arg2, %arg1 : i32, i32
  }
  func.func @transform_2(%arg0: i32, %arg1: i32, %arg2: i32) -> (i32, i32) {
    %c0_i32 = arith.constant 0 : i32
    %c0_i32_0 = arith.constant 0 : i32
    return %c0_i32, %arg1 : i32, i32
  }
  func.func @transform_3(%arg0: i32, %arg1: i32, %arg2: i32) -> (i32, i32) {
    %c0_i32 = arith.constant 0 : i32
    %c0_i32_0 = arith.constant 0 : i32
    return %c0_i32, %arg1 : i32, i32
  }
  func.func @transform_4(%arg0: i32, %arg1: i32, %arg2: i32) -> (i32, i32) {
    %c0_i32 = arith.constant 0 : i32
    return %arg0, %arg1 : i32, i32
  }
}

</mosaic_0001>

<bundles_post_ra>
// kernel: tpu_custom_call.1
= control target key start
LH: loop header
LB: loop body
LE: loop exit
PB: predicated region body
PF: predicated region fallthrough
CT: control target
= control target key end

     0   :  { %9 = vsyncpa [#allocation4], 0  ;;  %s2354_s0 = inlined_call_operand.hbm [shape: bf16[512,128], index: 0, kind: input, shape index: {}]   ;;  %s2355_s1 = inlined_call_operand.hbm [shape: bf16[128,128], index: 1, kind: input, shape index: {}]   ;;  %s2356_s2 = inlined_call_operand.vmem [shape: f32[1,128], index: 2, kind: input, shape index: {}]   ;;  %s2357_s3 = inlined_call_operand.vmem [shape: f32[1,128], index: 3, kind: input, shape index: {}]   ;;  %s2358_s4 = inlined_call_operand.hbm [shape: bf16[512,128], index: 4, kind: output, shape index: {}]  }
   0x1   :  { %10 = vsyncpa [#allocation7], 0 }
   0x2   :  { %11 = vsyncpa [#allocation5], 0  ;;  %s2141_s15 = smov [#allocation3]   ;;  %s2069_s19 = scalar_lea.hbm %s2354_s0, 4096 }
   0x3   :  { %s17_s16 = sshll.u32 %s2141_s15, 4  ;;  %p2070_p0 = scmp.ne.s32.totalorder %s2354_s0, %s2069_s19  ;;  %s18_s16 = int_to_ptr.vmem [resolvable:$true] %s17_s16 }
   0x4   :  { %p2073_p1 = scmp.lt.u32.totalorder %s2069_s19, %s2354_s0 }
   0x6   :  { %p2075_p2 = pnand %p2073_p1, %p2070_p0 }
   0x8   :  { %2078 = shalt.err (!%p2075_p2)
}
   0x9   :  { %s2079_s24 = scalar_lea.vmem %s18_s16, 4096  ;;  %p2084_p4 = scmp.lt.s32.totalorder %s18_s16, %s18_s16 }
   0xa   :  { %p2080_p3 = scmp.ne.s32.totalorder %s18_s16, %s2079_s24  ;;  %p2085_p5 = scmp.lt.s32.totalorder %s2079_s24, %s2079_s24 }
   0xc   :  { %p2086_p6 = por %p2085_p5, %p2084_p4 }
   0xe   :  { %p2087_p7 = pnand %p2086_p6, %p2080_p3 }
  0x10   :  { %2090 = shalt.err (!%p2087_p7)
}
  0x11   :  { %s2142_s25 = smov 64   ;;  %s2143_s26 = smov 4  }
  0x12   :  { %23 = dma.hbm_to_vmem [thread:$0]  %s2354_s0, 4096, %s18_s16, [#allocation4], %s2142_s25, %s2142_s25, %s2143_s26  }
  0x13   :  { %s2144_s29 = smov [#allocation6]   ;;  %s2091_s7 = scalar_lea.hbm %s2355_s1, 1024 }
  0x14   :  { %s29_s30 = sshll.u32 %s2144_s29, 4  ;;  %p2092_p8 = scmp.ne.s32.totalorder %s2355_s1, %s2091_s7  ;;  %s30_s30 = int_to_ptr.vmem [resolvable:$true] %s29_s30 }
  0x15   :  { %p2095_p9 = scmp.lt.u32.totalorder %s2091_s7, %s2355_s1 }
  0x17   :  { %p2097_p10 = pnand %p2095_p9, %p2092_p8 }
  0x19   :  { %2100 = shalt.err (!%p2097_p10)
}
  0x1a   :  { %s2101_s12 = scalar_lea.vmem %s30_s30, 1024  ;;  %p2106_p12 = scmp.lt.s32.totalorder %s30_s30, %s30_s30 }
  0x1b   :  { %p2102_p11 = scmp.ne.s32.totalorder %s30_s30, %s2101_s12  ;;  %p2107_p13 = scmp.lt.s32.totalorder %s2101_s12, %s2101_s12 }
  0x1d   :  { %p2108_p0 = por %p2107_p13, %p2106_p12 }
  0x1f   :  { %p2109_p1 = pnand %p2108_p0, %p2102_p11 }
  0x21   :  { %2112 = shalt.err (!%p2109_p1)
}
  0x22   :  { %35 = dma.hbm_to_vmem [thread:$0]  %s2355_s1, 1024, %s30_s30, [#allocation7], %s2142_s25, %s2142_s25, %s2143_s26  }
  0x23   :  { %2135 = dma.done.wait [#allocation4], 4096  }
  0x24   :  { %2136 = vsyncadd [#allocation4], 4294963200 }
  0x25   :  { %2137 = dma.done.wait [#allocation7], 1024  }
  0x26   :  { %2138 = vsyncadd [#allocation7], 4294966272  ;;  %v2029_v0 = vld [vmem:[#allocation6] sm:$0xff]   ;;  %v2030_v1 = vld [vmem:[#allocation6 + $0x8] sm:$0xff]  }
  0x27   :  { %1928 = vmatprep.subr.bf16.mxu0 %v2029_v0  ;;  %2008 = vmatprep.subr.bf16.mxu1 %v2029_v0  ;;  %v2031_v2 = vld [vmem:[#allocation6 + $0x10] sm:$0xff]   ;;  %v2032_v3 = vld [vmem:[#allocation6 + $0x18] sm:$0xff]   ;;  %v2037_v4 = vld [vmem:[#allocation3] sm:$0xff]  }
  0x28   :  { %1929 = vmatpush3.bf16.msra.mxu0 %v2029_v0  ;;  %2016 = vmatpush3.bf16.msra.mxu1 %v2029_v0  ;;  %v2038_v5 = vld [vmem:[#allocation3 + $0x80] sm:$0xff]   ;;  %v2034_v7 = vld [vmem:[#allocation6 + $0x28] sm:$0xff]   ;;  %v2035_v8 = vld [vmem:[#allocation6 + $0x30] sm:$0xff]  }
  0x29   :  { %1930 = vmatprep.subr.bf16.mxu0 %v2030_v1  ;;  %2009 = vmatprep.subr.bf16.mxu1 %v2030_v1  ;;  %v2033_v6 = vld [vmem:[#allocation6 + $0x20] sm:$0xff]   ;;  %v2036_v9 = vld [vmem:[#allocation6 + $0x38] sm:$0xff]   ;;  %v2039_v10 = vld [vmem:[#allocation3 + $0x8] sm:$0xff]  }
  0x2a   :  { %1944 = vmatprep.mubr.bf16.mxu0 %v2037_v4  ;;  %1976 = vmatprep.mubr.bf16.mxu1 %v2038_v5  ;;  %v2040_v11 = vld [vmem:[#allocation3 + $0x88] sm:$0xff]   ;;  %v2041_v12 = vld [vmem:[#allocation3 + $0x10] sm:$0xff]   ;;  %v2043_v14 = vld [vmem:[#allocation3 + $0x18] sm:$0xff]  }
  0x2b   :  { %v2042_v13 = vld [vmem:[#allocation3 + $0x90] sm:$0xff]   ;;  %v2044_v15 = vld [vmem:[#allocation3 + $0x98] sm:$0xff]   ;;  %v2045_v16 = vld [vmem:[#allocation3 + $0x20] sm:$0xff]  }
  0x2c   :  { %1931 = vmatpush3.bf16.msra.mxu0 %v2030_v1  ;;  %2017 = vmatpush3.bf16.msra.mxu1 %v2030_v1  ;;  %v2046_v17 = vld [vmem:[#allocation3 + $0xa0] sm:$0xff]   ;;  %v2047_v18 = vld [vmem:[#allocation3 + $0x28] sm:$0xff]   ;;  %v2049_v20 = vld [vmem:[#allocation3 + $0x30] sm:$0xff]  }
  0x2d   :  { %1932 = vmatprep.subr.bf16.mxu0 %v2031_v2  ;;  %2010 = vmatprep.subr.bf16.mxu1 %v2031_v2  ;;  %v2048_v19 = vld [vmem:[#allocation3 + $0xa8] sm:$0xff]   ;;  %v2050_v21 = vld [vmem:[#allocation3 + $0xb0] sm:$0xff]   ;;  %v2051_v22 = vld [vmem:[#allocation3 + $0x38] sm:$0xff]  }
  0x2e   :  { %v2052_v23 = vld [vmem:[#allocation3 + $0xb8] sm:$0xff]   ;;  %v2053_v24 = vld [vmem:[#allocation3 + $0x40] sm:$0xff]   ;;  %v2055_v26 = vld [vmem:[#allocation3 + $0x48] sm:$0xff]  }
  0x2f   :  { %v2054_v25 = vld [vmem:[#allocation3 + $0xc0] sm:$0xff]   ;;  %v2056_v27 = vld [vmem:[#allocation3 + $0xc8] sm:$0xff]   ;;  %v2057_v28 = vld [vmem:[#allocation3 + $0x50] sm:$0xff]  }
  0x30   :  { %1933 = vmatpush3.bf16.msra.mxu0 %v2031_v2  ;;  %2018 = vmatpush3.bf16.msra.mxu1 %v2031_v2  ;;  %v2058_v29 = vld [vmem:[#allocation3 + $0xd0] sm:$0xff]   ;;  %v2059_v30 = vld [vmem:[#allocation3 + $0x58] sm:$0xff]   ;;  %v2061_v32 = vld [vmem:[#allocation3 + $0x60] sm:$0xff]  }
  0x31   :  { %1934 = vmatprep.subr.bf16.mxu0 %v2032_v3  ;;  %2011 = vmatprep.subr.bf16.mxu1 %v2032_v3  ;;  %v2060_v31 = vld [vmem:[#allocation3 + $0xd8] sm:$0xff]   ;;  %v2062_v33 = vld [vmem:[#allocation3 + $0xe0] sm:$0xff]   ;;  %v2063_v34 = vld [vmem:[#allocation3 + $0x68] sm:$0xff]  }
  0x32   :  { %v2064_v35 = vld [vmem:[#allocation3 + $0xe8] sm:$0xff]   ;;  %v2065_v36 = vld [vmem:[#allocation3 + $0x70] sm:$0xff]   ;;  %v2067_v38 = vld [vmem:[#allocation3 + $0x78] sm:$0xff]  }
  0x33   :  { %v2066_v37 = vld [vmem:[#allocation3 + $0xf0] sm:$0xff]   ;;  %v2068_v39 = vld [vmem:[#allocation3 + $0xf8] sm:$0xff]   ;;  %v2204_v40 = vld [vmem:[%s2356_s2] ss:$0 sm:$0xff]  ;;  %s2145_s2 = smov [#allocation8]  }
  0x34   :  { %1935 = vmatpush3.bf16.msra.mxu0 %v2032_v3  ;;  %2019 = vmatpush3.bf16.msra.mxu1 %v2032_v3  ;;  %v2209_v42 = vld [vmem:[%s2357_s3] ss:$0 sm:$0xff]  ;;  %s1514_s3 = sshll.u32 %s2145_s2, 4  ;;  %s1515_s3 = int_to_ptr.vmem [resolvable:$true] %s1514_s3 }
  0x35   :  { %1936 = vmatprep.subr.bf16.mxu0 %v2033_v6  ;;  %2012 = vmatprep.subr.bf16.mxu1 %v2033_v6  ;;  %s2113_s17 = scalar_lea.vmem %s1515_s3, 4096  ;;  %p2118_p3 = scmp.lt.s32.totalorder %s1515_s3, %s1515_s3 }
  0x36   :  { %p2114_p2 = scmp.ne.s32.totalorder %s1515_s3, %s2113_s17  ;;  %p2119_p4 = scmp.lt.s32.totalorder %s2113_s17, %s2113_s17 }
  0x38   :  { %1937 = vmatpush3.bf16.msra.mxu0 %v2033_v6  ;;  %2020 = vmatpush3.bf16.msra.mxu1 %v2033_v6  ;;  %p2120_p5 = por %p2119_p4, %p2118_p3 }
  0x39   :  { %1938 = vmatprep.subr.bf16.mxu0 %v2034_v7  ;;  %2013 = vmatprep.subr.bf16.mxu1 %v2034_v7 }
  0x3a   :  { %p2121_p6 = pnand %p2120_p5, %p2114_p2 }
  0x3c   :  { %1939 = vmatpush3.bf16.msra.mxu0 %v2034_v7  ;;  %2021 = vmatpush3.bf16.msra.mxu1 %v2034_v7 }
  0x3d   :  { %1940 = vmatprep.subr.bf16.mxu0 %v2035_v8  ;;  %2014 = vmatprep.subr.bf16.mxu1 %v2035_v8 }
  0x40   :  { %1941 = vmatpush3.bf16.msra.mxu0 %v2035_v8  ;;  %2022 = vmatpush3.bf16.msra.mxu1 %v2035_v8 }
  0x41   :  { %1942 = vmatprep.subr.bf16.mxu0 %v2036_v9  ;;  %2015 = vmatprep.subr.bf16.mxu1 %v2036_v9 }
  0x44   :  { %1943 = vmatpush3.bf16.msra.mxu0 %v2036_v9  ;;  %2023 = vmatpush3.bf16.msra.mxu1 %v2036_v9 }
  0x47   :  { %1945 = vmatmul.mubr.bf16.vlgmr.msra.gmra.mrb[0].mxu0 %v2039_v10  ;;  %1977 = vmatmul.mubr.bf16.vlgmr.msra.gmra.mrb[0].mxu1 %v2040_v11 }
  0x48   :  { %1948 = vmatprep.mubr.bf16.mxu0 %v2041_v12  ;;  %1980 = vmatprep.mubr.bf16.mxu1 %v2042_v13 }
  0x4f   :  { %1949 = vmatmul.mubr.bf16.gmra.mrb[4].mxu0 %v2043_v14  ;;  %1981 = vmatmul.mubr.bf16.gmra.mrb[4].mxu1 %v2044_v15 }
  0x50   :  { %1952 = vmatprep.mubr.bf16.mxu0 %v2045_v16  ;;  %1984 = vmatprep.mubr.bf16.mxu1 %v2046_v17 }
  0x57   :  { %1953 = vmatmul.mubr.bf16.gmra.mrb[8].mxu0 %v2047_v18  ;;  %1985 = vmatmul.mubr.bf16.gmra.mrb[8].mxu1 %v2048_v19 }
  0x58   :  { %1956 = vmatprep.mubr.bf16.mxu0 %v2049_v20  ;;  %1988 = vmatprep.mubr.bf16.mxu1 %v2050_v21 }
  0x5f   :  { %1957 = vmatmul.mubr.bf16.gmra.mrb[12].mxu0 %v2051_v22  ;;  %1989 = vmatmul.mubr.bf16.gmra.mrb[12].mxu1 %v2052_v23 }
  0x60   :  { %1960 = vmatprep.mubr.bf16.mxu0 %v2053_v24  ;;  %1992 = vmatprep.mubr.bf16.mxu1 %v2054_v25 }
  0x67   :  { %1961 = vmatmul.mubr.bf16.gmra.mrb[16].mxu0 %v2055_v26  ;;  %1993 = vmatmul.mubr.bf16.gmra.mrb[16].mxu1 %v2056_v27 }
  0x68   :  { %1964 = vmatprep.mubr.bf16.mxu0 %v2057_v28  ;;  %1996 = vmatprep.mubr.bf16.mxu1 %v2058_v29 }
  0x6f   :  { %1965 = vmatmul.mubr.bf16.gmra.mrb[20].mxu0 %v2059_v30  ;;  %1997 = vmatmul.mubr.bf16.gmra.mrb[20].mxu1 %v2060_v31 }
  0x70   :  { %1968 = vmatprep.mubr.bf16.mxu0 %v2061_v32  ;;  %2000 = vmatprep.mubr.bf16.mxu1 %v2062_v33 }
  0x77   :  { %1969 = vmatmul.mubr.bf16.gmra.mrb[24].mxu0 %v2063_v34  ;;  %2001 = vmatmul.mubr.bf16.gmra.mrb[24].mxu1 %v2064_v35 }
  0x78   :  { %1972 = vmatprep.mubr.bf16.mxu0 %v2065_v36  ;;  %2004 = vmatprep.mubr.bf16.mxu1 %v2066_v37 }
  0x7f   :  { %1973 = vmatmul.mubr.bf16.gmra.mrb[28].mxu0 %v2067_v38  ;;  %2005 = vmatmul.mubr.bf16.gmra.mrb[28].mxu1 %v2068_v39 }
 0x11a   :  { %v1946_v41 = vpop.f32.mrb[0].mxu0  ;;  %v1978_v43 = vpop.f32.mrb[0].mxu1 }
 0x11b   :  { %v992_v44 = vmul.f32 %v1946_v41, %v2204_v40  ;;  %v1024_v45 = vmul.f32 %v1978_v43, %v2204_v40  ;;  %v533_v46 = vpop.f32.mrb[1].mxu0  ;;  %v661_v47 = vpop.f32.mrb[1].mxu1 }
 0x11c   :  { %v990_v48 = vmul.f32 %v2204_v40, %v533_v46  ;;  %v1022_v49 = vmul.f32 %v2204_v40, %v661_v47  ;;  %v1947_v50 = vpop.f32.mrb[2].mxu0  ;;  %v1979_v51 = vpop.f32.mrb[2].mxu1 }
 0x11d   :  { %v1063_v52 = vadd.f32 %v2209_v42, %v992_v44  ;;  %v1095_v53 = vadd.f32 %v2209_v42, %v1024_v45  ;;  %v993_v54 = vmul.f32 %v1947_v50, %v2204_v40  ;;  %v1025_v55 = vmul.f32 %v1979_v51, %v2204_v40  ;;  %v536_v56 = vpop.f32.mrb[3].mxu0  ;;  %v664_v57 = vpop.f32.mrb[3].mxu1 }
 0x11e   :  { %v1061_v58 = vadd.f32 %v2209_v42, %v990_v48  ;;  %v1093_v59 = vadd.f32 %v2209_v42, %v1022_v49  ;;  %v991_v60 = vmul.f32 %v2204_v40, %v536_v56  ;;  %v1023_v61 = vmul.f32 %v2204_v40, %v664_v57 }
 0x11f   :  { %v1064_v62 = vadd.f32 %v2209_v42, %v993_v54  ;;  %v1096_v63 = vadd.f32 %v2209_v42, %v1025_v55  ;;  %v1127_v2 = vmax.f32 %v1063_v52, 0.0  ;;  %v1159_v3 = vmax.f32 %v1095_v53, 0.0 }
 0x120   :  { %v1062_v0 = vadd.f32 %v2209_v42, %v991_v60  ;;  %v1094_v1 = vadd.f32 %v2209_v42, %v1023_v61  ;;  %v1125_v6 = vmax.f32 %v1061_v58, 0.0  ;;  %v1157_v7 = vmax.f32 %v1093_v59, 0.0 }
 0x121   :  { %v1128_v4 = vmax.f32 %v1064_v62, 0.0  ;;  %v1160_v5 = vmax.f32 %v1096_v63, 0.0 }
 0x122   :  { %v1126_v8 = vmax.f32 %v1062_v0, 0.0  ;;  %v1158_v9 = vmax.f32 %v1094_v1, 0.0  ;;  %v1950_v10 = vpop.f32.mrb[4].mxu0  ;;  %v1982_v11 = vpop.f32.mrb[4].mxu1 }
 0x123   :  { %v1705_v12 = vpack.c.bf16 %v1128_v4, %v1127_v2  ;;  %v1785_v13 = vpack.c.bf16 %v1160_v5, %v1159_v3  ;;  %v996_v14 = vmul.f32 %v1950_v10, %v2204_v40  ;;  %v1028_v15 = vmul.f32 %v1982_v11, %v2204_v40  ;;  %v549_v16 = vpop.f32.mrb[5].mxu0  ;;  %v677_v17 = vpop.f32.mrb[5].mxu1 }
 0x124   :  { %v1700_v18 = vpack.c.bf16 %v1126_v8, %v1125_v6  ;;  %v1780_v19 = vpack.c.bf16 %v1158_v9, %v1157_v7  ;;  %v994_v20 = vmul.f32 %v2204_v40, %v549_v16  ;;  %v1026_v21 = vmul.f32 %v2204_v40, %v677_v17  ;;  %v1951_v22 = vpop.f32.mrb[6].mxu0  ;;  %v1983_v23 = vpop.f32.mrb[6].mxu1 }
 0x125   :  { %1857 = vst [vmem:[#allocation8 + $0x8] sm:$0xff] %v1705_v12   ;;  %1873 = vst [vmem:[#allocation8 + $0x88] sm:$0xff] %v1785_v13   ;;  %v1067_v24 = vadd.f32 %v2209_v42, %v996_v14  ;;  %v1099_v25 = vadd.f32 %v2209_v42, %v1028_v15  ;;  %v997_v26 = vmul.f32 %v1951_v22, %v2204_v40  ;;  %v552_v28 = vpop.f32.mrb[7].mxu0  ;;  %v680_v29 = vpop.f32.mrb[7].mxu1 }
 0x126   :  { %v1029_v27 = vmul.f32 %v1983_v23, %v2204_v40  ;;  %1701 = vst [vmem:[#allocation8] sm:$0xff] %v1700_v18   ;;  %1872 = vst [vmem:[#allocation8 + $0x80] sm:$0xff] %v1780_v19   ;;  %v1065_v30 = vadd.f32 %v2209_v42, %v994_v20  ;;  %v1097_v31 = vadd.f32 %v2209_v42, %v1026_v21 }
 0x127   :  { %v995_v32 = vmul.f32 %v2204_v40, %v552_v28  ;;  %v1027_v33 = vmul.f32 %v2204_v40, %v680_v29  ;;  %v1068_v34 = vadd.f32 %v2209_v42, %v997_v26  ;;  %v1131_v38 = vmax.f32 %v1067_v24, 0.0 }
 0x128   :  { %v1100_v35 = vadd.f32 %v2209_v42, %v1029_v27  ;;  %v1163_v39 = vmax.f32 %v1099_v25, 0.0  ;;  %v1129_v44 = vmax.f32 %v1065_v30, 0.0  ;;  %v1161_v45 = vmax.f32 %v1097_v31, 0.0 }
 0x129   :  { %v1066_v36 = vadd.f32 %v2209_v42, %v995_v32  ;;  %v1098_v37 = vadd.f32 %v2209_v42, %v1027_v33  ;;  %v1132_v41 = vmax.f32 %v1068_v34, 0.0 }
 0x12a   :  { %v1164_v43 = vmax.f32 %v1100_v35, 0.0  ;;  %v1954_v48 = vpop.f32.mrb[8].mxu0  ;;  %v1986_v49 = vpop.f32.mrb[8].mxu1 }
 0x12b   :  { %v1130_v46 = vmax.f32 %v1066_v36, 0.0  ;;  %v1162_v47 = vmax.f32 %v1098_v37, 0.0  ;;  %v1715_v50 = vpack.c.bf16 %v1132_v41, %v1131_v38  ;;  %v1000_v52 = vmul.f32 %v1954_v48, %v2204_v40  ;;  %v565_v54 = vpop.f32.mrb[9].mxu0  ;;  %v693_v55 = vpop.f32.mrb[9].mxu1 }
 0x12c   :  { %v1795_v51 = vpack.c.bf16 %v1164_v43, %v1163_v39  ;;  %v1032_v53 = vmul.f32 %v1986_v49, %v2204_v40  ;;  %v998_v58 = vmul.f32 %v2204_v40, %v565_v54  ;;  %v1030_v59 = vmul.f32 %v2204_v40, %v693_v55  ;;  %v1955_v60 = vpop.f32.mrb[10].mxu0  ;;  %v1987_v61 = vpop.f32.mrb[10].mxu1 }
 0x12d   :  { %v1710_v56 = vpack.c.bf16 %v1130_v46, %v1129_v44  ;;  %v1790_v57 = vpack.c.bf16 %v1162_v47, %v1161_v45  ;;  %1859 = vst [vmem:[#allocation8 + $0x18] sm:$0xff] %v1715_v50   ;;  %v1071_v62 = vadd.f32 %v2209_v42, %v1000_v52  ;;  %v1001_v0 = vmul.f32 %v1955_v60, %v2204_v40  ;;  %v568_v2 = vpop.f32.mrb[11].mxu0  ;;  %v696_v3 = vpop.f32.mrb[11].mxu1 }
 0x12e   :  { %1875 = vst [vmem:[#allocation8 + $0x98] sm:$0xff] %v1795_v51   ;;  %v1103_v63 = vadd.f32 %v2209_v42, %v1032_v53  ;;  %v1033_v1 = vmul.f32 %v1987_v61, %v2204_v40  ;;  %v1069_v4 = vadd.f32 %v2209_v42, %v998_v58  ;;  %v1101_v5 = vadd.f32 %v2209_v42, %v1030_v59 }
 0x12f   :  { %1858 = vst [vmem:[#allocation8 + $0x10] sm:$0xff] %v1710_v56   ;;  %1874 = vst [vmem:[#allocation8 + $0x90] sm:$0xff] %v1790_v57   ;;  %v999_v6 = vmul.f32 %v2204_v40, %v568_v2  ;;  %v1031_v7 = vmul.f32 %v2204_v40, %v696_v3  ;;  %v1072_v8 = vadd.f32 %v2209_v42, %v1001_v0  ;;  %v1135_v12 = vmax.f32 %v1071_v62, 0.0 }
 0x130   :  { %v1104_v9 = vadd.f32 %v2209_v42, %v1033_v1  ;;  %v1167_v13 = vmax.f32 %v1103_v63, 0.0  ;;  %v1133_v16 = vmax.f32 %v1069_v4, 0.0  ;;  %v1165_v17 = vmax.f32 %v1101_v5, 0.0 }
 0x131   :  { %v1070_v10 = vadd.f32 %v2209_v42, %v999_v6  ;;  %v1102_v11 = vadd.f32 %v2209_v42, %v1031_v7  ;;  %v1136_v14 = vmax.f32 %v1072_v8, 0.0 }
 0x132   :  { %v1168_v15 = vmax.f32 %v1104_v9, 0.0  ;;  %v1958_v20 = vpop.f32.mrb[12].mxu0  ;;  %v1990_v21 = vpop.f32.mrb[12].mxu1 }
 0x133   :  { %v1134_v18 = vmax.f32 %v1070_v10, 0.0  ;;  %v1166_v19 = vmax.f32 %v1102_v11, 0.0  ;;  %v1725_v22 = vpack.c.bf16 %v1136_v14, %v1135_v12  ;;  %v1004_v24 = vmul.f32 %v1958_v20, %v2204_v40  ;;  %v581_v26 = vpop.f32.mrb[13].mxu0  ;;  %v709_v27 = vpop.f32.mrb[13].mxu1 }
 0x134   :  { %v1805_v23 = vpack.c.bf16 %v1168_v15, %v1167_v13  ;;  %v1036_v25 = vmul.f32 %v1990_v21, %v2204_v40  ;;  %v1002_v30 = vmul.f32 %v2204_v40, %v581_v26  ;;  %v1034_v31 = vmul.f32 %v2204_v40, %v709_v27  ;;  %v1959_v32 = vpop.f32.mrb[14].mxu0  ;;  %v1991_v33 = vpop.f32.mrb[14].mxu1 }
 0x135   :  { %v1720_v28 = vpack.c.bf16 %v1134_v18, %v1133_v16  ;;  %v1800_v29 = vpack.c.bf16 %v1166_v19, %v1165_v17  ;;  %1861 = vst [vmem:[#allocation8 + $0x28] sm:$0xff] %v1725_v22   ;;  %v1075_v34 = vadd.f32 %v2209_v42, %v1004_v24  ;;  %v1005_v36 = vmul.f32 %v1959_v32, %v2204_v40  ;;  %v584_v38 = vpop.f32.mrb[15].mxu0  ;;  %v712_v39 = vpop.f32.mrb[15].mxu1 }
 0x136   :  { %1877 = vst [vmem:[#allocation8 + $0xa8] sm:$0xff] %v1805_v23   ;;  %v1107_v35 = vadd.f32 %v2209_v42, %v1036_v25  ;;  %v1037_v37 = vmul.f32 %v1991_v33, %v2204_v40  ;;  %v1073_v41 = vadd.f32 %v2209_v42, %v1002_v30  ;;  %v1105_v43 = vadd.f32 %v2209_v42, %v1034_v31 }
 0x137   :  { %1860 = vst [vmem:[#allocation8 + $0x20] sm:$0xff] %v1720_v28   ;;  %1876 = vst [vmem:[#allocation8 + $0xa0] sm:$0xff] %v1800_v29   ;;  %v1003_v44 = vmul.f32 %v2204_v40, %v584_v38  ;;  %v1035_v45 = vmul.f32 %v2204_v40, %v712_v39  ;;  %v1076_v46 = vadd.f32 %v2209_v42, %v1005_v36  ;;  %v1139_v50 = vmax.f32 %v1075_v34, 0.0 }
 0x138   :  { %v1108_v47 = vadd.f32 %v2209_v42, %v1037_v37  ;;  %v1171_v51 = vmax.f32 %v1107_v35, 0.0  ;;  %v1137_v54 = vmax.f32 %v1073_v41, 0.0  ;;  %v1169_v55 = vmax.f32 %v1105_v43, 0.0 }
 0x139   :  { %v1074_v48 = vadd.f32 %v2209_v42, %v1003_v44  ;;  %v1106_v49 = vadd.f32 %v2209_v42, %v1035_v45  ;;  %v1140_v52 = vmax.f32 %v1076_v46, 0.0 }
 0x13a   :  { %v1172_v53 = vmax.f32 %v1108_v47, 0.0  ;;  %v1962_v58 = vpop.f32.mrb[16].mxu0  ;;  %v1994_v59 = vpop.f32.mrb[16].mxu1 }
 0x13b   :  { %v1138_v56 = vmax.f32 %v1074_v48, 0.0  ;;  %v1170_v57 = vmax.f32 %v1106_v49, 0.0  ;;  %v1735_v60 = vpack.c.bf16 %v1140_v52, %v1139_v50  ;;  %v1008_v62 = vmul.f32 %v1962_v58, %v2204_v40  ;;  %v597_v0 = vpop.f32.mrb[17].mxu0  ;;  %v725_v1 = vpop.f32.mrb[17].mxu1 }
 0x13c   :  { %v1815_v61 = vpack.c.bf16 %v1172_v53, %v1171_v51  ;;  %v1040_v63 = vmul.f32 %v1994_v59, %v2204_v40  ;;  %v1006_v4 = vmul.f32 %v2204_v40, %v597_v0  ;;  %v1038_v5 = vmul.f32 %v2204_v40, %v725_v1  ;;  %v1963_v6 = vpop.f32.mrb[18].mxu0  ;;  %v1995_v7 = vpop.f32.mrb[18].mxu1 }
 0x13d   :  { %v1730_v2 = vpack.c.bf16 %v1138_v56, %v1137_v54  ;;  %v1810_v3 = vpack.c.bf16 %v1170_v57, %v1169_v55  ;;  %1863 = vst [vmem:[#allocation8 + $0x38] sm:$0xff] %v1735_v60   ;;  %v1079_v8 = vadd.f32 %v2209_v42, %v1008_v62  ;;  %v1009_v10 = vmul.f32 %v1963_v6, %v2204_v40  ;;  %v600_v12 = vpop.f32.mrb[19].mxu0  ;;  %v728_v13 = vpop.f32.mrb[19].mxu1 }
 0x13e   :  { %1879 = vst [vmem:[#allocation8 + $0xb8] sm:$0xff] %v1815_v61   ;;  %v1111_v9 = vadd.f32 %v2209_v42, %v1040_v63  ;;  %v1041_v11 = vmul.f32 %v1995_v7, %v2204_v40  ;;  %v1077_v14 = vadd.f32 %v2209_v42, %v1006_v4  ;;  %v1109_v15 = vadd.f32 %v2209_v42, %v1038_v5 }
 0x13f   :  { %1862 = vst [vmem:[#allocation8 + $0x30] sm:$0xff] %v1730_v2   ;;  %1878 = vst [vmem:[#allocation8 + $0xb0] sm:$0xff] %v1810_v3   ;;  %v1007_v16 = vmul.f32 %v2204_v40, %v600_v12  ;;  %v1039_v17 = vmul.f32 %v2204_v40, %v728_v13  ;;  %v1080_v18 = vadd.f32 %v2209_v42, %v1009_v10  ;;  %v1143_v22 = vmax.f32 %v1079_v8, 0.0 }
 0x140   :  { %v1112_v19 = vadd.f32 %v2209_v42, %v1041_v11  ;;  %v1175_v23 = vmax.f32 %v1111_v9, 0.0  ;;  %v1141_v26 = vmax.f32 %v1077_v14, 0.0  ;;  %v1173_v27 = vmax.f32 %v1109_v15, 0.0 }
 0x141   :  { %v1078_v20 = vadd.f32 %v2209_v42, %v1007_v16  ;;  %v1110_v21 = vadd.f32 %v2209_v42, %v1039_v17  ;;  %v1144_v24 = vmax.f32 %v1080_v18, 0.0 }
 0x142   :  { %v1176_v25 = vmax.f32 %v1112_v19, 0.0  ;;  %v1966_v30 = vpop.f32.mrb[20].mxu0  ;;  %v1998_v31 = vpop.f32.mrb[20].mxu1 }
 0x143   :  { %v1142_v28 = vmax.f32 %v1078_v20, 0.0  ;;  %v1174_v29 = vmax.f32 %v1110_v21, 0.0  ;;  %v1745_v32 = vpack.c.bf16 %v1144_v24, %v1143_v22  ;;  %v1012_v34 = vmul.f32 %v1966_v30, %v2204_v40  ;;  %v613_v36 = vpop.f32.mrb[21].mxu0  ;;  %v741_v37 = vpop.f32.mrb[21].mxu1 }
 0x144   :  { %v1825_v33 = vpack.c.bf16 %v1176_v25, %v1175_v23  ;;  %v1044_v35 = vmul.f32 %v1998_v31, %v2204_v40  ;;  %v1010_v41 = vmul.f32 %v2204_v40, %v613_v36  ;;  %v1042_v43 = vmul.f32 %v2204_v40, %v741_v37  ;;  %v1967_v44 = vpop.f32.mrb[22].mxu0  ;;  %v1999_v45 = vpop.f32.mrb[22].mxu1 }
 0x145   :  { %v1740_v38 = vpack.c.bf16 %v1142_v28, %v1141_v26  ;;  %v1820_v39 = vpack.c.bf16 %v1174_v29, %v1173_v27  ;;  %1865 = vst [vmem:[#allocation8 + $0x48] sm:$0xff] %v1745_v32   ;;  %v1083_v46 = vadd.f32 %v2209_v42, %v1012_v34  ;;  %v1013_v48 = vmul.f32 %v1967_v44, %v2204_v40  ;;  %v616_v50 = vpop.f32.mrb[23].mxu0  ;;  %v744_v51 = vpop.f32.mrb[23].mxu1 }
 0x146   :  { %1881 = vst [vmem:[#allocation8 + $0xc8] sm:$0xff] %v1825_v33   ;;  %v1115_v47 = vadd.f32 %v2209_v42, %v1044_v35  ;;  %v1045_v49 = vmul.f32 %v1999_v45, %v2204_v40  ;;  %v1081_v52 = vadd.f32 %v2209_v42, %v1010_v41  ;;  %v1113_v53 = vadd.f32 %v2209_v42, %v1042_v43 }
 0x147   :  { %1864 = vst [vmem:[#allocation8 + $0x40] sm:$0xff] %v1740_v38   ;;  %1880 = vst [vmem:[#allocation8 + $0xc0] sm:$0xff] %v1820_v39   ;;  %v1011_v54 = vmul.f32 %v2204_v40, %v616_v50  ;;  %v1043_v55 = vmul.f32 %v2204_v40, %v744_v51  ;;  %v1084_v56 = vadd.f32 %v2209_v42, %v1013_v48  ;;  %v1147_v60 = vmax.f32 %v1083_v46, 0.0 }
 0x148   :  { %v1116_v57 = vadd.f32 %v2209_v42, %v1045_v49  ;;  %v1179_v61 = vmax.f32 %v1115_v47, 0.0  ;;  %v1145_v0 = vmax.f32 %v1081_v52, 0.0  ;;  %v1177_v1 = vmax.f32 %v1113_v53, 0.0 }
 0x149   :  { %v1082_v58 = vadd.f32 %v2209_v42, %v1011_v54  ;;  %v1114_v59 = vadd.f32 %v2209_v42, %v1043_v55  ;;  %v1148_v62 = vmax.f32 %v1084_v56, 0.0 }
 0x14a   :  { %v1180_v63 = vmax.f32 %v1116_v57, 0.0  ;;  %v1970_v4 = vpop.f32.mrb[24].mxu0  ;;  %v2002_v5 = vpop.f32.mrb[24].mxu1 }
 0x14b   :  { %v1146_v2 = vmax.f32 %v1082_v58, 0.0  ;;  %v1178_v3 = vmax.f32 %v1114_v59, 0.0  ;;  %v1755_v6 = vpack.c.bf16 %v1148_v62, %v1147_v60  ;;  %v1016_v8 = vmul.f32 %v1970_v4, %v2204_v40  ;;  %v629_v10 = vpop.f32.mrb[25].mxu0  ;;  %v757_v11 = vpop.f32.mrb[25].mxu1 }
 0x14c   :  { %v1835_v7 = vpack.c.bf16 %v1180_v63, %v1179_v61  ;;  %v1048_v9 = vmul.f32 %v2002_v5, %v2204_v40  ;;  %v1014_v14 = vmul.f32 %v2204_v40, %v629_v10  ;;  %v1046_v15 = vmul.f32 %v2204_v40, %v757_v11  ;;  %v1971_v16 = vpop.f32.mrb[26].mxu0  ;;  %v2003_v17 = vpop.f32.mrb[26].mxu1 }
 0x14d   :  { %v1750_v12 = vpack.c.bf16 %v1146_v2, %v1145_v0  ;;  %v1830_v13 = vpack.c.bf16 %v1178_v3, %v1177_v1  ;;  %1867 = vst [vmem:[#allocation8 + $0x58] sm:$0xff] %v1755_v6   ;;  %v1087_v18 = vadd.f32 %v2209_v42, %v1016_v8  ;;  %v1017_v20 = vmul.f32 %v1971_v16, %v2204_v40  ;;  %v632_v22 = vpop.f32.mrb[27].mxu0  ;;  %v760_v23 = vpop.f32.mrb[27].mxu1 }
 0x14e   :  { %1883 = vst [vmem:[#allocation8 + $0xd8] sm:$0xff] %v1835_v7   ;;  %v1119_v19 = vadd.f32 %v2209_v42, %v1048_v9  ;;  %v1049_v21 = vmul.f32 %v2003_v17, %v2204_v40  ;;  %v1085_v24 = vadd.f32 %v2209_v42, %v1014_v14  ;;  %v1117_v25 = vadd.f32 %v2209_v42, %v1046_v15 }
 0x14f   :  { %1866 = vst [vmem:[#allocation8 + $0x50] sm:$0xff] %v1750_v12   ;;  %1882 = vst [vmem:[#allocation8 + $0xd0] sm:$0xff] %v1830_v13   ;;  %v1015_v26 = vmul.f32 %v2204_v40, %v632_v22  ;;  %v1047_v27 = vmul.f32 %v2204_v40, %v760_v23  ;;  %v1088_v28 = vadd.f32 %v2209_v42, %v1017_v20  ;;  %v1151_v32 = vmax.f32 %v1087_v18, 0.0 }
 0x150   :  { %v1120_v29 = vadd.f32 %v2209_v42, %v1049_v21  ;;  %v1183_v33 = vmax.f32 %v1119_v19, 0.0  ;;  %v1149_v36 = vmax.f32 %v1085_v24, 0.0  ;;  %v1181_v37 = vmax.f32 %v1117_v25, 0.0 }
 0x151   :  { %v1086_v30 = vadd.f32 %v2209_v42, %v1015_v26  ;;  %v1118_v31 = vadd.f32 %v2209_v42, %v1047_v27  ;;  %v1152_v34 = vmax.f32 %v1088_v28, 0.0 }
 0x152   :  { %v1184_v35 = vmax.f32 %v1120_v29, 0.0  ;;  %v1974_v41 = vpop.f32.mrb[28].mxu0  ;;  %v2006_v43 = vpop.f32.mrb[28].mxu1 }
 0x153   :  { %v1150_v38 = vmax.f32 %v1086_v30, 0.0  ;;  %v1182_v39 = vmax.f32 %v1118_v31, 0.0  ;;  %v1765_v44 = vpack.c.bf16 %v1152_v34, %v1151_v32  ;;  %v1020_v46 = vmul.f32 %v1974_v41, %v2204_v40  ;;  %v645_v48 = vpop.f32.mrb[29].mxu0  ;;  %v773_v49 = vpop.f32.mrb[29].mxu1 }
 0x154   :  { %v1845_v45 = vpack.c.bf16 %v1184_v35, %v1183_v33  ;;  %v1052_v47 = vmul.f32 %v2006_v43, %v2204_v40  ;;  %v1018_v52 = vmul.f32 %v2204_v40, %v645_v48  ;;  %v1050_v53 = vmul.f32 %v2204_v40, %v773_v49  ;;  %v1975_v54 = vpop.f32.mrb[30].mxu0  ;;  %v2007_v55 = vpop.f32.mrb[30].mxu1 }
 0x155   :  { %v1760_v50 = vpack.c.bf16 %v1150_v38, %v1149_v36  ;;  %v1840_v51 = vpack.c.bf16 %v1182_v39, %v1181_v37  ;;  %1869 = vst [vmem:[#allocation8 + $0x68] sm:$0xff] %v1765_v44   ;;  %v1091_v56 = vadd.f32 %v2209_v42, %v1020_v46  ;;  %v1021_v58 = vmul.f32 %v1975_v54, %v2204_v40  ;;  %v648_v60 = vpop.f32.mrb[31].mxu0  ;;  %v776_v61 = vpop.f32.mrb[31].mxu1 }
 0x156   :  { %1885 = vst [vmem:[#allocation8 + $0xe8] sm:$0xff] %v1845_v45   ;;  %v1123_v57 = vadd.f32 %v2209_v42, %v1052_v47  ;;  %v1053_v59 = vmul.f32 %v2007_v55, %v2204_v40  ;;  %v1089_v62 = vadd.f32 %v2209_v42, %v1018_v52  ;;  %v1121_v63 = vadd.f32 %v2209_v42, %v1050_v53 }
 0x157   :  { %1868 = vst [vmem:[#allocation8 + $0x60] sm:$0xff] %v1760_v50   ;;  %1884 = vst [vmem:[#allocation8 + $0xe0] sm:$0xff] %v1840_v51   ;;  %v1019_v0 = vmul.f32 %v2204_v40, %v648_v60  ;;  %v1051_v1 = vmul.f32 %v2204_v40, %v776_v61  ;;  %v1092_v2 = vadd.f32 %v2209_v42, %v1021_v58  ;;  %v1155_v6 = vmax.f32 %v1091_v56, 0.0 }
 0x158   :  { %v1124_v3 = vadd.f32 %v2209_v42, %v1053_v59  ;;  %v1187_v7 = vmax.f32 %v1123_v57, 0.0  ;;  %v1153_v10 = vmax.f32 %v1089_v62, 0.0  ;;  %v1185_v11 = vmax.f32 %v1121_v63, 0.0 }
 0x159   :  { %v1090_v4 = vadd.f32 %v2209_v42, %v1019_v0  ;;  %v1122_v5 = vadd.f32 %v2209_v42, %v1051_v1  ;;  %v1156_v8 = vmax.f32 %v1092_v2, 0.0 }
 0x15a   :  { %v1188_v9 = vmax.f32 %v1124_v3, 0.0 }
 0x15b   :  { %v1154_v12 = vmax.f32 %v1090_v4, 0.0  ;;  %v1186_v13 = vmax.f32 %v1122_v5, 0.0  ;;  %v1775_v14 = vpack.c.bf16 %v1156_v8, %v1155_v6 }
 0x15c   :  { %v1855_v40 = vpack.c.bf16 %v1188_v9, %v1187_v7 }
 0x15d   :  { %v1770_v15 = vpack.c.bf16 %v1154_v12, %v1153_v10  ;;  %v1850_v16 = vpack.c.bf16 %v1186_v13, %v1185_v11  ;;  %1871 = vst [vmem:[#allocation8 + $0x78] sm:$0xff] %v1775_v14  }
 0x15e   :  { %1887 = vst [vmem:[#allocation8 + $0xf8] sm:$0xff] %v1855_v40  }
 0x15f   :  { %1870 = vst [vmem:[#allocation8 + $0x70] sm:$0xff] %v1770_v15   ;;  %1886 = vst [vmem:[#allocation8 + $0xf0] sm:$0xff] %v1850_v16  }
 0x160   :  { %2124 = shalt.err (!%p2121_p6)
}
 0x161   :  { %s2125_s20 = scalar_lea.hbm %s2358_s4, 4096 }
 0x162   :  { %p2126_p7 = scmp.ne.s32.totalorder %s2358_s4, %s2125_s20  ;;  %p2129_p8 = scmp.lt.u32.totalorder %s2125_s20, %s2358_s4 }
 0x164   :  { %p2131_p9 = pnand %p2129_p8, %p2126_p7 }
 0x166   :  { %2134 = shalt.err (!%p2131_p9)
}
 0x167   :  { %1520 = dma.vmem_to_hbm [thread:$0]  %s1515_s3, 4096, %s2358_s4, [#allocation5], %s2142_s25, %s2142_s25, %s2143_s26  }
 0x168   :  { %2139 = dma.done.wait [#allocation5], 4096  }
 0x169   :  { %2140 = vsyncadd [#allocation5], 4294963200 }
 0x16a   :  { %1524 = vsyncpa [#allocation4], 1 }
 0x16b   :  { %1525 = vsyncpa [#allocation7], 1 }
 0x16c   :  { %1526 = vsyncpa [#allocation5], 1 }

</bundles_post_ra>
